<compile_context>
chip_gen: v7x
topology: tpu7x:2x2x1
jax: 0.10.0
libtpu: 0.0.40
codegen_flags: <defaults>
</compile_context>

<pallas_src>
import jax
import jax.numpy as jnp
from jax.experimental import pallas as pl
from jax.experimental.pallas import tpu as pltpu


def channel_attention_kernel(x_ref, w1t_ref, w2t_ref, o_ref):
    # x_ref : (TB, C, HW)  batch tile, spatial flattened onto the lane axis
    # w1t_ref: (C, Cr)     fc1 weight, transposed  (1x1 conv C -> Cr, no bias)
    # w2t_ref: (Cr, C)     fc2 weight, transposed  (1x1 conv Cr -> C, no bias)
    # o_ref : (TB, C)      sigmoid(fc2(relu(fc1(avg))) + fc2(relu(fc1(max))))
    x = x_ref[...]                                  # (TB, C, HW)
    tb = o_ref.shape[0]
    inv_hw = 1.0 / x_ref.shape[-1]                  # static Python constant

    # AdaptiveAvgPool2d(1) / AdaptiveMaxPool2d(1) == lane-axis reductions (XLU).
    # Sum accumulates in f32; max stays in the input dtype, upcast after.
    avg = jnp.sum(x.astype(jnp.float32), axis=-1) * inv_hw       # (TB, C) f32
    mx = jnp.max(x, axis=-1).astype(jnp.float32)                 # (TB, C) f32

    # Fuse both branches + all TB rows into one matmul chain.
    pooled = jnp.concatenate([avg, mx], axis=0)                  # (2*TB, C)
    w1t = w1t_ref[...].astype(jnp.float32)                       # (C, Cr)
    w2t = w2t_ref[...].astype(jnp.float32)                       # (Cr, C)

    h = jnp.dot(pooled, w1t, preferred_element_type=jnp.float32)  # (2*TB, Cr)
    h = jnp.maximum(h, 0.0)                                       # ReLU
    y = jnp.dot(h, w2t, preferred_element_type=jnp.float32)       # (2*TB, C)

    out = y[:tb] + y[tb:]                                         # avg + max
    o_ref[...] = jax.nn.sigmoid(out).astype(o_ref.dtype)


def channel_attention(x, w1, w2):
    """x: (B, C, H, W) NCHW; w1: (Cr, C, 1, 1); w2: (C, Cr, 1, 1).
    Returns (B, C, 1, 1), matching the PyTorch module."""
    B, C, H, W = x.shape
    Cr = w1.shape[0]
    HW = H * W

    x_flat = x.reshape(B, C, HW)
    w1t = jnp.transpose(w1.reshape(Cr, C))          # (C, Cr)
    w2t = jnp.transpose(w2.reshape(C, Cr))          # (Cr, C)

    # Batch-tile sizing: keep ONE input buffer under ~16 MiB so BlockSpec
    # double-buffering (2x) stays well inside the smallest VMEM (v7x: 64 MiB
    # physical, 32 MiB scoped default — we raise the limit explicitly below).
    itemsize = jnp.dtype(x.dtype).itemsize
    per_row_bytes = C * HW * itemsize
    tb_cap = max(1, (16 * 1024 * 1024) // per_row_bytes)

    if B <= tb_cap:
        # Whole batch in a single grid step (optimal for v5e/v6e single-TC).
        TB = B
        B_pad = B
    else:
        # Multi-step grid: TB a multiple of 8 so the (TB, C) output block
        # satisfies the (8, 128) sublane constraint; pad B and slice after.
        TB = max(8, (tb_cap // 8) * 8)
        B_pad = ((B + TB - 1) // TB) * TB
        # TODO(synk): for single images too large for VMEM (huge H*W), add an
        # 'arbitrary' HW-chunk reduction axis with running sum/max scratch.

    if B_pad != B:
        # Padded rows are processed independently and sliced off below, so
        # they cannot corrupt real outputs.
        x_flat = jnp.pad(x_flat, ((0, B_pad - B), (0, 0), (0, 0)))

    out = pl.pallas_call(
        channel_attention_kernel,
        out_shape=jax.ShapeDtypeStruct((B_pad, C), x.dtype),
        grid_spec=pltpu.PrefetchScalarGridSpec(
            num_scalar_prefetch=0,
            grid=(B_pad // TB,),
            in_specs=[
                pl.BlockSpec((TB, C, HW), lambda b: (b, 0, 0)),
                pl.BlockSpec((C, Cr), lambda b: (0, 0)),
                pl.BlockSpec((Cr, C), lambda b: (0, 0)),
            ],
            out_specs=pl.BlockSpec((TB, C), lambda b: (b, 0)),
        ),
        compiler_params=pltpu.CompilerParams(
            dimension_semantics=("parallel",),
            vmem_limit_bytes=64 * 1024 * 1024,
        ),
    )(x_flat, w1t, w2t)

    if B_pad != B:
        out = out[:B]
    return out.reshape(B, C, 1, 1)


def channel_attention_ref(x, w1, w2):
    """Plain-JAX reference matching the PyTorch forward."""
    B, C, H, W = x.shape
    Cr = w1.shape[0]
    w1m = w1.reshape(Cr, C)
    w2m = w2.reshape(C, Cr)
    avg = jnp.mean(x.astype(jnp.float32), axis=(2, 3))   # (B, C)
    mx = jnp.max(x, axis=(2, 3)).astype(jnp.float32)     # (B, C)

    def mlp(p):
        return jnp.maximum(p @ w1m.T, 0.0) @ w2m.T

    out = jax.nn.sigmoid(mlp(avg) + mlp(mx))
    return out.astype(x.dtype).reshape(B, C, 1, 1)


if __name__ == "__main__":
    # Shapes consistent with the module: in_planes=64, ratio=16 -> Cr=4.
    B, C, H, W = 2, 64, 16, 16
    ratio = 16
    Cr = C // ratio

    key = jax.random.PRNGKey(0)
    kx, k1, k2 = jax.random.split(key, 3)
    x = jax.random.normal(kx, (B, C, H, W), dtype=jnp.float32)
    # Deterministic synthetic 1x1-conv weights (kaiming-like scale).
    w1 = jax.random.normal(k1, (Cr, C, 1, 1), dtype=jnp.float32) * (2.0 / C) ** 0.5
    w2 = jax.random.normal(k2, (C, Cr, 1, 1), dtype=jnp.float32) * (2.0 / Cr) ** 0.5

    out = channel_attention(x, w1, w2)
    out = jax.block_until_ready(out)

    ref = jax.block_until_ready(channel_attention_ref(x, w1, w2))
    assert out.shape == (B, C, 1, 1)
    assert jnp.allclose(out, ref, atol=1e-5, rtol=1e-5), "mismatch vs reference"

    print("KERNEL_OK")
</pallas_src>

<mosaic_0001>
module attributes {stable_mosaic.version = 11 : i64} {
  func.func @channel_attention_kernel(%arg0: i32, %arg1: memref<2x64x256xf32, #tpu.memory_space<vmem>>, %arg2: memref<64x4xf32, #tpu.memory_space<vmem>>, %arg3: memref<4x64xf32, #tpu.memory_space<vmem>>, %arg4: memref<2x64xf32, #tpu.memory_space<vmem>>) attributes {dimension_semantics = [#tpu.dimension_semantics<parallel>], iteration_bounds = array<i64: 1>, scalar_prefetch = 0 : i64, scratch_operands = 0 : i64, tpu.core_type = #tpu.core_type<tc>, window_params = [{transform_indices = @transform_0, window_bounds = array<i64: 2, 64, 256>}, {pipeline_mode = #tpu.pipeline_mode<synchronous>, transform_indices = @transform_1, window_bounds = array<i64: 64, 4>}, {pipeline_mode = #tpu.pipeline_mode<synchronous>, transform_indices = @transform_2, window_bounds = array<i64: 4, 64>}, {transform_indices = @transform_3, window_bounds = array<i64: 2, 64>}]} {
    %c0 = arith.constant 0 : index
    %c0_0 = arith.constant 0 : index
    %c0_1 = arith.constant 0 : index
    %0 = vector.load %arg1[%c0, %c0_0, %c0_1] : memref<2x64x256xf32, #tpu.memory_space<vmem>>, vector<2x64x256xf32>
    %cst = arith.constant dense<0.000000e+00> : vector<2x64xf32>
    %1 = vector.multi_reduction <add>, %0, %cst [2] : vector<2x64x256xf32> to vector<2x64xf32>
    %cst_2 = arith.constant 3.906250e-03 : f32
    %2 = vector.broadcast %cst_2 : f32 to vector<2x64xf32>
    %3 = arith.mulf %1, %2 : vector<2x64xf32>
    %cst_3 = arith.constant dense<0xFF800000> : vector<2x64xf32>
    %4 = vector.multi_reduction <maximumf>, %0, %cst_3 [2] : vector<2x64x256xf32> to vector<2x64xf32>
    %5 = tpu.concatenate %3, %4 in 0 : vector<2x64xf32>, vector<2x64xf32> -> vector<4x64xf32>
    %c0_4 = arith.constant 0 : index
    %c0_5 = arith.constant 0 : index
    %6 = vector.load %arg2[%c0_4, %c0_5] : memref<64x4xf32, #tpu.memory_space<vmem>>, vector<64x4xf32>
    %c0_6 = arith.constant 0 : index
    %c0_7 = arith.constant 0 : index
    %7 = vector.load %arg3[%c0_6, %c0_7] : memref<4x64xf32, #tpu.memory_space<vmem>>, vector<4x64xf32>
    %cst_8 = arith.constant dense<0.000000e+00> : vector<4x4xf32>
    %8 = tpu.matmul %5, %6, %cst_8 {dimension_numbers = #tpu.dot_dimension_numbers<[1], [0], [0], [1], [0, 0, 1, 1], [], []>} : vector<4x64xf32>, vector<64x4xf32>, vector<4x4xf32> -> vector<4x4xf32>
    %cst_9 = arith.constant 0.000000e+00 : f32
    %9 = vector.broadcast %cst_9 : f32 to vector<4x4xf32>
    %10 = arith.maximumf %8, %9 : vector<4x4xf32>
    %cst_10 = arith.constant dense<0.000000e+00> : vector<4x64xf32>
    %11 = tpu.matmul %10, %7, %cst_10 {dimension_numbers = #tpu.dot_dimension_numbers<[1], [0], [0], [1], [0, 0, 1, 1], [], []>} : vector<4x4xf32>, vector<4x64xf32>, vector<4x64xf32> -> vector<4x64xf32>
    %12 = vector.extract_strided_slice %11 {offsets = [0, 0], sizes = [2, 64], strides = [1, 1]} : vector<4x64xf32> to vector<2x64xf32>
    %13 = vector.extract_strided_slice %11 {offsets = [2, 0], sizes = [2, 64], strides = [1, 1]} : vector<4x64xf32> to vector<2x64xf32>
    %14 = arith.addf %12, %13 : vector<2x64xf32>
    %15 = arith.negf %14 : vector<2x64xf32>
    %16 = math.exp %15 : vector<2x64xf32>
    %cst_11 = arith.constant 1.000000e+00 : f32
    %17 = vector.broadcast %cst_11 : f32 to vector<2x64xf32>
    %18 = arith.addf %17, %16 : vector<2x64xf32>
    %19 = arith.divf %17, %18 : vector<2x64xf32>
    %c0_12 = arith.constant 0 : index
    %c0_13 = arith.constant 0 : index
    %20 = vector.load %arg4[%c0_12, %c0_13] : memref<2x64xf32, #tpu.memory_space<vmem>>, vector<2x64xf32>
    tpu.vector_store %arg4[%c0_12, %c0_13], %19 {strides = array<i32>} : memref<2x64xf32, #tpu.memory_space<vmem>>, vector<2x64xf32>,
    return
  }
  func.func @transform_0(%arg0: i32) -> (i32, i32, i32) {
    %c0_i32 = arith.constant 0 : i32
    %c0_i32_0 = arith.constant 0 : i32
    %c0_i32_1 = arith.constant 0 : i32
    return %arg0, %c0_i32, %c0_i32_0 : i32, i32, i32
  }
  func.func @transform_1(%arg0: i32) -> (i32, i32) {
    %c0_i32 = arith.constant 0 : i32
    %c0_i32_0 = arith.constant 0 : i32
    %c0_i32_1 = arith.constant 0 : i32
    return %c0_i32, %c0_i32_0 : i32, i32
  }
  func.func @transform_2(%arg0: i32) -> (i32, i32) {
    %c0_i32 = arith.constant 0 : i32
    %c0_i32_0 = arith.constant 0 : i32
    %c0_i32_1 = arith.constant 0 : i32
    return %c0_i32, %c0_i32_0 : i32, i32
  }
  func.func @transform_3(%arg0: i32) -> (i32, i32) {
    %c0_i32 = arith.constant 0 : i32
    %c0_i32_0 = arith.constant 0 : i32
    return %arg0, %c0_i32 : i32, i32
  }
}

</mosaic_0001>

<bundles_post_ra>
// kernel: tpu_custom_call.1
= control target key start
LH: loop header
LB: loop body
LE: loop exit
PB: predicated region body
PF: predicated region fallthrough
CT: control target
= control target key end

     0   :  { %8 = vsyncpa [#allocation3], 0  ;;  %s947_s0 = inlined_call_operand.hbm [shape: f32[2,64,256], index: 0, kind: input, shape index: {}]   ;;  %s948_s1 = inlined_call_operand.hbm [shape: f32[64,4], index: 1, kind: input, shape index: {}]   ;;  %s949_s2 = inlined_call_operand.hbm [shape: f32[4,64], index: 2, kind: input, shape index: {}]   ;;  %s950_s3 = inlined_call_operand.hbm [shape: f32[2,64], index: 3, kind: output, shape index: {}]  }
   0x1   :  { %9 = vsyncpa [#allocation6], 0 }
   0x2   :  { %10 = vsyncpa [#allocation4], 0  ;;  %s760_s12 = smov [#allocation5]   ;;  %s666_s16 = scalar_lea.hbm %s948_s1, 1024 }
   0x3   :  { %s28_s13 = sshll.u32 %s760_s12, 4  ;;  %p667_p0 = scmp.ne.s32.totalorder %s948_s1, %s666_s16  ;;  %s29_s13 = int_to_ptr.vmem [resolvable:$true] %s28_s13 }
   0x4   :  { %p670_p1 = scmp.lt.u32.totalorder %s666_s16, %s948_s1 }
   0x6   :  { %p672_p2 = pnand %p670_p1, %p667_p0 }
   0x8   :  { %675 = shalt.err (!%p672_p2)
}
   0x9   :  { %s676_s21 = scalar_lea.vmem %s29_s13, 1024  ;;  %p681_p4 = scmp.lt.s32.totalorder %s29_s13, %s29_s13 }
   0xa   :  { %p677_p3 = scmp.ne.s32.totalorder %s29_s13, %s676_s21  ;;  %p682_p5 = scmp.lt.s32.totalorder %s676_s21, %s676_s21 }
   0xc   :  { %p683_p6 = por %p682_p5, %p681_p4 }
   0xe   :  { %p684_p7 = pnand %p683_p6, %p677_p3 }
  0x10   :  { %687 = shalt.err (!%p684_p7)
}
  0x11   :  { %s761_s22 = smov 128   ;;  %s762_s23 = smov 8  }
  0x12   :  { %34 = dma.hbm_to_vmem [thread:$0]  %s948_s1, 1024, %s29_s13, [#allocation6], %s761_s22, %s761_s22, %s762_s23  }
  0x13   :  { %s763_s26 = smov [#allocation2]   ;;  %s688_s30 = scalar_lea.hbm %s947_s0, 4096 }
  0x14   :  { %s16_s27 = sshll.u32 %s763_s26, 4  ;;  %p689_p8 = scmp.ne.s32.totalorder %s947_s0, %s688_s30  ;;  %s17_s27 = int_to_ptr.vmem [resolvable:$true] %s16_s27 }
  0x15   :  { %p692_p9 = scmp.lt.u32.totalorder %s688_s30, %s947_s0 }
  0x17   :  { %p694_p10 = pnand %p692_p9, %p689_p8 }
  0x19   :  { %697 = shalt.err (!%p694_p10)
}
  0x1a   :  { %s698_s8 = scalar_lea.vmem %s17_s27, 4096  ;;  %p703_p12 = scmp.lt.s32.totalorder %s17_s27, %s17_s27 }
  0x1b   :  { %p699_p11 = scmp.ne.s32.totalorder %s17_s27, %s698_s8  ;;  %p704_p13 = scmp.lt.s32.totalorder %s698_s8, %s698_s8 }
  0x1d   :  { %p705_p0 = por %p704_p13, %p703_p12 }
  0x1f   :  { %p706_p1 = pnand %p705_p0, %p699_p11 }
  0x21   :  { %709 = shalt.err (!%p706_p1)
}
  0x22   :  { %s764_s1 = smov 256   ;;  %s765_s9 = smov 16  }
  0x23   :  { %22 = dma.hbm_to_vmem [thread:$0]  %s947_s0, 4096, %s17_s27, [#allocation3], %s764_s1, %s764_s1, %s765_s9  }
  0x24   :  { %s766_s12 = smov [#allocation7]   ;;  %s710_s16 = scalar_lea.hbm %s949_s2, 64 }
  0x25   :  { %s41_s13 = sshll.u32 %s766_s12, 4  ;;  %p711_p2 = scmp.ne.s32.totalorder %s949_s2, %s710_s16  ;;  %s42_s13 = int_to_ptr.vmem [resolvable:$true] %s41_s13 }
  0x26   :  { %p714_p3 = scmp.lt.u32.totalorder %s710_s16, %s949_s2 }
  0x28   :  { %p716_p4 = pnand %p714_p3, %p711_p2 }
  0x2a   :  { %719 = shalt.err (!%p716_p4)
}
  0x2b   :  { %s720_s21 = scalar_lea.vmem %s42_s13, 64  ;;  %p725_p6 = scmp.lt.s32.totalorder %s42_s13, %s42_s13 }
  0x2c   :  { %p721_p5 = scmp.ne.s32.totalorder %s42_s13, %s720_s21  ;;  %p726_p7 = scmp.lt.s32.totalorder %s720_s21, %s720_s21 }
  0x2e   :  { %p727_p8 = por %p726_p7, %p725_p6 }
  0x30   :  { %p728_p9 = pnand %p727_p8, %p721_p5 }
  0x32   :  { %731 = shalt.err (!%p728_p9)
}
  0x33   :  { %44 = dma.hbm_to_vmem [thread:$0]  %s949_s2, 64, %s42_s13, [#allocation6]  }
  0x34   :  { %754 = dma.done.wait [#allocation3], 4096  }
  0x35   :  { %755 = vsyncadd [#allocation3], 4294963200 }
  0x36   :  { %756 = dma.done.wait [#allocation6], 1088  }
  0x37   :  { %757 = vsyncadd [#allocation6], 4294966208  ;;  %v70_v0 = vld [vmem:[#allocation2 + $0x80] sm:$0xff]  ;;  %v71_v1 = vld [vmem:[#allocation2 + $0x88] sm:$0xff]  ;;  %vm768_vm0 = vmmov 0   ;;  %vm225_vm1 = vcmask 130112  }
  0x38   :  { %v54_v2 = vld [vmem:[#allocation2] sm:$0xff]  ;;  %v110_v3 = vadd.f32 %v71_v1, %v70_v0  ;;  %v55_v4 = vld [vmem:[#allocation2 + $0x8] sm:$0xff]  ;;  %v72_v5 = vld [vmem:[#allocation2 + $0x90] sm:$0xff]  ;;  %v174_v27 = vmax.f32 %v70_v0, %v71_v1  ;;  %vm232_vm2 = vcmask 195712   ;;  %vm239_vm3 = vcmask 261312   ;;  %s770_s2 = smov [#allocation8]  }
  0x39   :  { %v73_v6 = vld [vmem:[#allocation2 + $0x98] sm:$0xff]  ;;  %v86_v7 = vadd.f32 %v55_v4, %v54_v2  ;;  %v56_v8 = vld [vmem:[#allocation2 + $0x10] sm:$0xff]  ;;  %v74_v12 = vld [vmem:[#allocation2 + $0xa0] sm:$0xff]  ;;  %v150_v25 = vmax.f32 %v54_v2, %v55_v4  ;;  %vm246_vm4 = vcmask 326912   ;;  %vm253_vm5 = vcmask 392512   ;;  %s590_s23 = sshll.u32 %s770_s2, 4  ;;  %s591_s23 = int_to_ptr.vmem [resolvable:$true] %s590_s23 }
  0x3a   :  { %v57_v9 = vld [vmem:[#allocation2 + $0x18] sm:$0xff]  ;;  %111 = vadd.xlane.f32.xlu1 %v110_v3  ;;  %v113_v10 = vadd.f32 %v73_v6, %v72_v5  ;;  %v75_v13 = vld [vmem:[#allocation2 + $0xa8] sm:$0xff]  ;;  %v58_v14 = vld [vmem:[#allocation2 + $0x20] sm:$0xff]  ;;  %v177_v26 = vmax.f32 %v72_v5, %v73_v6  ;;  %v767_v3 = vmov 0.0|0.0   ;;  %vm260_vm6 = vcmask 458112   ;;  %s732_s24 = scalar_lea.vmem %s591_s23, 32  ;;  %p737_p11 = scmp.lt.s32.totalorder %s591_s23, %s591_s23 }
  0x3b   :  { %87 = vadd.xlane.f32.xlu0 %v86_v7  ;;  %v89_v11 = vadd.f32 %v57_v9, %v56_v8  ;;  %v59_v15 = vld [vmem:[#allocation2 + $0x28] sm:$0xff]  ;;  %v116_v16 = vadd.f32 %v75_v13, %v74_v12  ;;  %v76_v18 = vld [vmem:[#allocation2 + $0xb0] sm:$0xff]  ;;  %v77_v19 = vld [vmem:[#allocation2 + $0xb8] sm:$0xff]  ;;  %v153_v24 = vmax.f32 %v56_v8, %v57_v9  ;;  %v180_v34 = vmax.f32 %v74_v12, %v75_v13  ;;  %p733_p10 = scmp.ne.s32.totalorder %s591_s23, %s732_s24  ;;  %p738_p12 = scmp.lt.s32.totalorder %s732_s24, %s732_s24 }
  0x3c   :  { %v92_v17 = vadd.f32 %v59_v15, %v58_v14  ;;  %v60_v20 = vld [vmem:[#allocation2 + $0x30] sm:$0xff]  ;;  %v61_v21 = vld [vmem:[#allocation2 + $0x38] sm:$0xff]  ;;  %v119_v22 = vadd.f32 %v77_v19, %v76_v18  ;;  %v78_v28 = vld [vmem:[#allocation2 + $0xc0] sm:$0xff]  ;;  %v156_v35 = vmax.f32 %v58_v14, %v59_v15  ;;  %v183_v42 = vmax.f32 %v76_v18, %v77_v19  ;;  %639 = vmatprep.subr.bf16.mxu0 %v767_v3 }
  0x3d   :  { %v95_v23 = vadd.f32 %v61_v21, %v60_v20  ;;  %v79_v29 = vld [vmem:[#allocation2 + $0xc8] sm:$0xff]  ;;  %v62_v30 = vld [vmem:[#allocation2 + $0x40] sm:$0xff]  ;;  %v80_v36 = vld [vmem:[#allocation2 + $0xd0] sm:$0xff]  ;;  %v159_v43 = vmax.f32 %v60_v20, %v61_v21  ;;  %v769_v13 = vmov 0.0   ;;  %vm267_vm7 = vcmask 523712   ;;  %p739_p13 = por %p738_p12, %p737_p11 }
  0x3e   :  { %114 = vadd.xlane.f32.xlu1 %v113_v10  ;;  %v63_v31 = vld [vmem:[#allocation2 + $0x48] sm:$0xff]  ;;  %v122_v32 = vadd.f32 %v79_v29, %v78_v28  ;;  %v81_v37 = vld [vmem:[#allocation2 + $0xd8] sm:$0xff]  ;;  %v64_v38 = vld [vmem:[#allocation2 + $0x50] sm:$0xff]  ;;  %v186_v50 = vmax.f32 %v78_v28, %v79_v29  ;;  %631 = vmatprep.mubr.msk.f32.mxu0 %vm768_vm0, %v769_v13  ;;  %vm308_vm8 = vcmask 1041409   ;;  %vm405_vm9 = vcmask 1043459  }
  0x3f   :  { %90 = vadd.xlane.f32.xlu0 %v89_v11  ;;  %v98_v33 = vadd.f32 %v63_v31, %v62_v30  ;;  %v65_v39 = vld [vmem:[#allocation2 + $0x58] sm:$0xff]  ;;  %v125_v40 = vadd.f32 %v81_v37, %v80_v36  ;;  %v82_v44 = vld [vmem:[#allocation2 + $0xe0] sm:$0xff]  ;;  %v83_v45 = vld [vmem:[#allocation2 + $0xe8] sm:$0xff]  ;;  %v162_v51 = vmax.f32 %v62_v30, %v63_v31  ;;  %v189_v58 = vmax.f32 %v80_v36, %v81_v37  ;;  %p740_p0 = pnand %p739_p13, %p733_p10 }
  0x40   :  { %v101_v41 = vadd.f32 %v65_v39, %v64_v38  ;;  %v66_v46 = vld [vmem:[#allocation2 + $0x60] sm:$0xff]  ;;  %v67_v47 = vld [vmem:[#allocation2 + $0x68] sm:$0xff]  ;;  %v128_v48 = vadd.f32 %v83_v45, %v82_v44  ;;  %v84_v52 = vld [vmem:[#allocation2 + $0xf0] sm:$0xff]  ;;  %v165_v59 = vmax.f32 %v64_v38, %v65_v39  ;;  %v192_v60 = vmax.f32 %v82_v44, %v83_v45  ;;  %634 = vmatprep.subr.mxu1 %v769_v13 }
  0x41   :  { %v104_v49 = vadd.f32 %v67_v47, %v66_v46  ;;  %v85_v53 = vld [vmem:[#allocation2 + $0xf8] sm:$0xff]  ;;  %v68_v54 = vld [vmem:[#allocation2 + $0x70] sm:$0xff]  ;;  %v168_v61 = vmax.f32 %v66_v46, %v67_v47  ;;  %v410_v0 = vld [vmem:[#allocation5] sm:$0xff]  ;;  %636 = vmatprep.mubr.msk.f32.mxu1 %vm768_vm0, %v769_v13  ;;  %v214_v30 = vlaneseq  ;;  %vm408_vm10 = vcmask 1041408  }
  0x42   :  { %117 = vadd.xlane.f32.xlu1 %v116_v16  ;;  %v69_v55 = vld [vmem:[#allocation2 + $0x78] sm:$0xff]  ;;  %v131_v56 = vadd.f32 %v85_v53, %v84_v52  ;;  %v195_v62 = vmax.f32 %v84_v52, %v85_v53  ;;  %v411_v1 = vld [vmem:[#allocation5 + $0x8] sm:$0xff]  ;;  %v412_v4 = vld [vmem:[#allocation5 + $0x10] sm:$0xff]  ;;  %vm419_vm11 = vcmask 523264   ;;  %vm498_vm12 = vcmask 1043456  }
  0x43   :  { %93 = vadd.xlane.f32.xlu0 %v92_v17  ;;  %v107_v57 = vadd.f32 %v69_v55, %v68_v54  ;;  %v171_v63 = vmax.f32 %v68_v54, %v69_v55  ;;  %v640_v2 = vpack.c.bf16 %v411_v1, %v410_v0  ;;  %v413_v5 = vld [vmem:[#allocation5 + $0x18] sm:$0xff]  ;;  %v414_v7 = vld [vmem:[#allocation5 + $0x20] sm:$0xff]  ;;  %v415_v8 = vld [vmem:[#allocation5 + $0x28] sm:$0xff]  ;;  %vm494_vm13 = vcmask 31744  }
  0x44   :  { %v643_v6 = vpack.c.bf16 %v413_v5, %v412_v4  ;;  %v646_v9 = vpack.c.bf16 %v415_v8, %v414_v7  ;;  %v416_v10 = vld [vmem:[#allocation5 + $0x30] sm:$0xff]  ;;  %v417_v11 = vld [vmem:[#allocation5 + $0x38] sm:$0xff]  ;;  %vm582_vm14 = vcmask 517120  }
  0x45   :  { %641 = vmatpush3.bf16.msra.mxu0 %v640_v2  ;;  %v649_v12 = vpack.c.bf16 %v417_v11, %v416_v10 }
  0x46   :  { %120 = vadd.xlane.f32.xlu1 %v119_v22  ;;  %642 = vmatprep.subr.bf16.mxu0 %v767_v3 }
  0x47   :  { %96 = vadd.xlane.f32.xlu0 %v95_v23 }
  0x49   :  { %644 = vmatpush3.bf16.msra.mxu0 %v643_v6 }
  0x4a   :  { %154 = vmax.xlane.f32.xlu1 %v153_v24  ;;  %645 = vmatprep.subr.bf16.mxu0 %v767_v3 }
  0x4b   :  { %151 = vmax.xlane.f32.xlu0 %v150_v25 }
  0x4d   :  { %647 = vmatpush3.bf16.msra.mxu0 %v646_v9 }
  0x4e   :  { %178 = vmax.xlane.f32.xlu1 %v177_v26  ;;  %648 = vmatprep.subr.bf16.mxu0 %v767_v3 }
  0x4f   :  { %175 = vmax.xlane.f32.xlu0 %v174_v27 }
  0x51   :  { %650 = vmatpush3.bf16.msra.mxu0 %v649_v12 }
  0x52   :  { %123 = vadd.xlane.f32.xlu1 %v122_v32 }
  0x53   :  { %99 = vadd.xlane.f32.xlu0 %v98_v33  ;;  %v215_v33 = vand.u32 127, %v214_v30 }
  0x55   :  { %v220_v36 = vadd.s32 4294967288, %v215_v33  ;;  %v227_v37 = vadd.s32 4294967280, %v215_v33  ;;  %v234_v39 = vadd.s32 4294967272, %v215_v33  ;;  %v241_v47 = vadd.s32 4294967264, %v215_v33 }
  0x56   :  { %181 = vmax.xlane.f32.xlu1 %v180_v34  ;;  %v217_v34 = vshrl.u32 %v214_v30, 7  ;;  %v255_v52 = vadd.s32 4294967248, %v215_v33 }
  0x57   :  { %157 = vmax.xlane.f32.xlu0 %v156_v35 }
  0x58   :  { %v847_v44 = vsub.s32 %v227_v37, %v217_v34  ;;  %v863_v4 = vsub.s32 %v255_v52, %v217_v34 }
  0x5a   :  { %126 = vadd.xlane.f32.xlu1 %v125_v40  ;;  %v843_v40 = vsub.s32 %v215_v33, %v217_v34 }
  0x5b   :  { %102 = vadd.xlane.f32.xlu0 %v101_v41 }
  0x5e   :  { %184 = vmax.xlane.f32.xlu1 %v183_v42  ;;  %v845_v42 = vsub.s32 %v220_v36, %v217_v34 }
  0x5f   :  { %160 = vmax.xlane.f32.xlu0 %v159_v43 }
  0x62   :  { %129 = vadd.xlane.f32.xlu1 %v128_v48  ;;  %v248_v48 = vadd.s32 4294967256, %v215_v33 }
  0x63   :  { %105 = vadd.xlane.f32.xlu0 %v104_v49 }
  0x64   :  { %v859_v0 = vsub.s32 %v248_v48, %v217_v34 }
  0x66   :  { %187 = vmax.xlane.f32.xlu1 %v186_v50 }
  0x67   :  { %163 = vmax.xlane.f32.xlu0 %v162_v51  ;;  %v849_v51 = vsub.s32 %v234_v39, %v217_v34 }
  0x6a   :  { %132 = vadd.xlane.f32.xlu1 %v131_v56 }
  0x6b   :  { %108 = vadd.xlane.f32.xlu0 %v107_v57  ;;  %v262_v57 = vadd.s32 4294967240, %v215_v33 }
  0x6d   :  { %v868_v8 = vsub.s32 %v262_v57, %v217_v34 }
  0x6e   :  { %190 = vmax.xlane.f32.xlu1 %v189_v58 }
  0x6f   :  { %166 = vmax.xlane.f32.xlu0 %v165_v59 }
  0x72   :  { %193 = vmax.xlane.f32.xlu1 %v192_v60 }
  0x73   :  { %169 = vmax.xlane.f32.xlu0 %v168_v61 }
  0x76   :  { %196 = vmax.xlane.f32.xlu1 %v195_v62  ;;  %v857_v62 = vsub.s32 %v241_v47, %v217_v34 }
  0x77   :  { %172 = vmax.xlane.f32.xlu0 %v171_v63 }
  0xc7   :  { %v112_v14 = vpop.xlane.xlu1 %111 }
  0xc8   :  { %v88_v15 = vpop.xlane.xlu0 %87  ;;  %v142_v49 = vmul.f32 0.00390625, %v112_v14 }
  0xc9   :  { %v134_v53 = vmul.f32 0.00390625, %v88_v15 }
  0xca   :  { %v272_v1 = vrot.slane %v142_v49, %v843_v40 }
  0xcb   :  { %v115_v16 = vpop.xlane.xlu1 %114  ;;  %v219_v5 = vrot.slane %v134_v53, %v843_v40 }
  0xcc   :  { %v91_v17 = vpop.xlane.xlu0 %90  ;;  %v143_v43 = vmul.f32 0.00390625, %v115_v16 }
  0xcd   :  { %v135_v46 = vmul.f32 0.00390625, %v91_v17 }
  0xce   :  { %v276_v58 = vrot.slane %v143_v43, %v845_v42 }
  0xcf   :  { %v118_v18 = vpop.xlane.xlu1 %117  ;;  %v224_v61 = vrot.slane %v135_v46, %v845_v42 }
  0xd0   :  { %v94_v19 = vpop.xlane.xlu0 %93  ;;  %v144_v50 = vmul.f32 0.00390625, %v118_v18  ;;  %v277_v10 = vsel %vm225_vm1, %v276_v58, %v272_v1 }
  0xd1   :  { %v136_v54 = vmul.f32 0.00390625, %v94_v19  ;;  %v226_v15 = vsel %vm225_vm1, %v224_v61, %v219_v5 }
  0xd2   :  { %v281_v2 = vrot.slane %v144_v50, %v847_v44 }
  0xd3   :  { %v121_v20 = vpop.xlane.xlu1 %120  ;;  %v231_v6 = vrot.slane %v136_v54, %v847_v44 }
  0xd4   :  { %v97_v21 = vpop.xlane.xlu0 %96  ;;  %v145_v55 = vmul.f32 0.00390625, %v121_v20  ;;  %v282_v19 = vsel %vm232_vm2, %v281_v2, %v277_v10 }
  0xd5   :  { %v137_v59 = vmul.f32 0.00390625, %v97_v21 }
  0xd6   :  { %v286_v7 = vrot.slane %v145_v55, %v849_v51 }
  0xd7   :  { %v827_v22 = vpop.xlane.xlu1 %154  ;;  %v238_v11 = vrot.slane %v137_v59, %v849_v51 }
  0xd8   :  { %v829_v23 = vpop.xlane.xlu0 %151  ;;  %v334_v12 = vrot.slane %v827_v22, %v845_v42 }
  0xd9   :  { %v330_v13 = vrot.slane %v829_v23, %v843_v40  ;;  %v233_v23 = vsel %vm232_vm2, %v231_v6, %v226_v15 }
  0xdb   :  { %v831_v24 = vpop.xlane.xlu1 %178 }
  0xdc   :  { %v833_v25 = vpop.xlane.xlu0 %175  ;;  %v373_v16 = vrot.slane %v831_v24, %v845_v42  ;;  %v240_v24 = vsel %vm239_vm3, %v238_v11, %v233_v23 }
  0xdd   :  { %v369_v17 = vrot.slane %v833_v25, %v843_v40  ;;  %v335_v25 = vsel %vm225_vm1, %v334_v12, %v330_v13 }
  0xdf   :  { %v124_v26 = vpop.xlane.xlu1 %123  ;;  %v374_v39 = vsel %vm225_vm1, %v373_v16, %v369_v17  ;;  %v418_v16 = vld [vmem:[#allocation7] sm:$0xf] }
  0xe0   :  { %v100_v27 = vpop.xlane.xlu0 %99  ;;  %v146_v63 = vmul.f32 0.00390625, %v124_v26  ;;  %v287_v26 = vsel %vm239_vm3, %v286_v7, %v282_v19  ;;  %635 = vmatpush3.msk.msra.mxu1 %vm498_vm12, %v418_v16 }
  0xe1   :  { %v138_v3 = vmul.f32 0.00390625, %v100_v27 }
  0xe2   :  { %v291_v18 = vrot.slane %v146_v63, %v857_v62 }
  0xe3   :  { %v835_v28 = vpop.xlane.xlu1 %181  ;;  %v245_v20 = vrot.slane %v138_v3, %v857_v62 }
  0xe4   :  { %v837_v29 = vpop.xlane.xlu0 %157  ;;  %v378_v34 = vrot.slane %v835_v28, %v847_v44 }
  0xe6   :  { %v379_v48 = vsel %vm232_vm2, %v378_v34, %v374_v39 }
  0xe7   :  { %v127_v31 = vpop.xlane.xlu1 %126 }
  0xe8   :  { %v103_v32 = vpop.xlane.xlu0 %102  ;;  %v147_v21 = vmul.f32 0.00390625, %v127_v31  ;;  %v292_v31 = vsel %vm246_vm4, %v291_v18, %v287_v26 }
  0xe9   :  { %v139_v22 = vmul.f32 0.00390625, %v103_v32  ;;  %v339_v32 = vrot.slane %v837_v29, %v847_v44 }
  0xea   :  { %v296_v42 = vrot.slane %v147_v21, %v859_v0 }
  0xeb   :  { %v839_v35 = vpop.xlane.xlu1 %184  ;;  %v252_v43 = vrot.slane %v139_v22, %v859_v0 }
  0xec   :  { %v841_v38 = vpop.xlane.xlu0 %160  ;;  %v383_v28 = vrot.slane %v839_v35, %v849_v51  ;;  %v297_v55 = vsel %vm253_vm5, %v296_v42, %v292_v31 }
  0xee   :  { %v384_v57 = vsel %vm239_vm3, %v383_v28, %v379_v48 }
  0xef   :  { %v130_v41 = vpop.xlane.xlu1 %129 }
  0xf0   :  { %v106_v45 = vpop.xlane.xlu0 %105  ;;  %v148_v27 = vmul.f32 0.00390625, %v130_v41  ;;  %v247_v41 = vsel %vm246_vm4, %v245_v20, %v240_v24 }
  0xf1   :  { %v140_v30 = vmul.f32 0.00390625, %v106_v45  ;;  %v344_v45 = vrot.slane %v841_v38, %v849_v51  ;;  %v340_v38 = vsel %vm232_vm2, %v339_v32, %v335_v25 }
  0xf2   :  { %v301_v46 = vrot.slane %v148_v27, %v863_v4 }
  0xf3   :  { %v851_v56 = vpop.xlane.xlu1 %187  ;;  %v259_v47 = vrot.slane %v140_v30, %v863_v4  ;;  %v345_v59 = vsel %vm239_vm3, %v344_v45, %v340_v38 }
  0xf4   :  { %v854_v60 = vpop.xlane.xlu0 %163  ;;  %v388_v29 = vrot.slane %v851_v56, %v857_v62  ;;  %v254_v56 = vsel %vm253_vm5, %v252_v43, %v247_v41 }
  0xf5   :  { %v349_v49 = vrot.slane %v854_v60, %v857_v62  ;;  %v302_v60 = vsel %vm260_vm6, %v301_v46, %v297_v55  ;;  %v261_v61 = vsel %vm260_vm6, %v259_v47, %v254_v56 }
  0xf6   :  { %v389_v62 = vsel %vm246_vm4, %v388_v29, %v384_v57 }
  0xf7   :  { %v133_v9 = vpop.xlane.xlu1 %132 }
  0xf8   :  { %v109_v14 = vpop.xlane.xlu0 %108  ;;  %v149_v36 = vmul.f32 0.00390625, %v133_v9 }
  0xf9   :  { %v141_v40 = vmul.f32 0.00390625, %v109_v14 }
  0xfa   :  { %v306_v50 = vrot.slane %v149_v36, %v868_v8 }
  0xfb   :  { %v191_v33 = vpop.xlane.xlu1 %190  ;;  %v266_v51 = vrot.slane %v141_v40, %v868_v8 }
  0xfc   :  { %v167_v37 = vpop.xlane.xlu0 %166  ;;  %v393_v35 = vrot.slane %v191_v33, %v859_v0  ;;  %v307_v1 = vsel %vm267_vm7, %v306_v50, %v302_v60 }
  0xfd   :  { %v354_v53 = vrot.slane %v167_v37, %v859_v0  ;;  %v350_v0 = vsel %vm246_vm4, %v349_v49, %v345_v59 }
  0xfe   :  { %v394_v2 = vsel %vm253_vm5, %v393_v35, %v389_v62 }
  0xff   :  { %v194_v44 = vpop.xlane.xlu1 %193  ;;  %v355_v6 = vsel %vm253_vm5, %v354_v53, %v350_v0 }
 0x100   :  { %v170_v52 = vpop.xlane.xlu0 %169  ;;  %v398_v54 = vrot.slane %v194_v44, %v863_v4 }
 0x101   :  { %v359_v58 = vrot.slane %v170_v52, %v863_v4  ;;  %v268_v4 = vsel %vm267_vm7, %v266_v51, %v261_v61 }
 0x102   :  { %v399_v7 = vsel %vm260_vm6, %v398_v54, %v394_v2  ;;  %v309_v13 = vsel %vm308_vm8, %v307_v1, %v268_v4 }
 0x103   :  { %v197_v63 = vpop.xlane.xlu1 %196  ;;  %v360_v10 = vsel %vm260_vm6, %v359_v58, %v355_v6 }
 0x104   :  { %v403_v3 = vrot.slane %v197_v63, %v868_v8  ;;  %v173_v5 = vpop.xlane.xlu0 %172 }
 0x105   :  { %v364_v9 = vrot.slane %v173_v5, %v868_v8 }
 0x106   :  { %v404_v11 = vsel %vm267_vm7, %v403_v3, %v399_v7 }
 0x107   :  { %v365_v12 = vsel %vm267_vm7, %v364_v9, %v360_v10 }
 0x108   :  { %v406_v14 = vsel %vm405_vm9, %v404_v11, %v365_v12 }
 0x109   :  { %v409_v15 = vsel %vm408_vm10, %v309_v13, %v406_v14 }
 0x10a   :  { %632 = vmatmul.mubr.msk.f32.vlgmr.msra.gmra.mrb[0].mxu0 %vm419_vm11, %v409_v15 }
 0x1dd   :  { %v489_v17 = vpop.f32.mrb[0].mxu0 }
 0x1de   :  { %v493_v8 = vmax.f32 %v489_v17, 0.0  ;;  %v633_v18 = vpop.f32.mrb[1].mxu0 }
 0x1e0   :  { %637 = vmatmul.mubr.msk.f32.vlgmr.msra.gmra.mrb[0].mxu1 %vm494_vm13, %v493_v8 }
 0x2b3   :  { %v568_v19 = vpop.f32.mrb[0].mxu1 }
 0x2b4   :  { %v573_v20 = vrot.slane %v568_v19, 2  ;;  %v638_v21 = vpop.f32.mrb[1].mxu1 }
 0x2b6   :  { %v575_v22 = vadd.f32 %v573_v20, %v568_v19 }
 0x2b8   :  { %v603_v23 = vmul.f32 -1.442695, %v575_v22 }
 0x2ba   :  { %662 = vpow2.f32 %v603_v23 }
 0x2c4   :  { %v663_v26 = vpop.eup %662 }
 0x2c5   :  { %v579_v27 = vadd.f32 1.0, %v663_v26 }
 0x2c7   :  { %664 = vrcp.f32 %v579_v27 }
 0x2d1   :  { %v665_v30 = vpop.eup %664 }
 0x2d2   :  { %583 = vst.msk [vmem:[#allocation8] sm:$0x3] %vm582_vm14, %v665_v30 }
 0x2d3   :  { %743 = shalt.err (!%p740_p0)
}
 0x2d4   :  { %s744_s27 = scalar_lea.hbm %s950_s3, 32 }
 0x2d5   :  { %p745_p1 = scmp.ne.s32.totalorder %s950_s3, %s744_s27  ;;  %p748_p2 = scmp.lt.u32.totalorder %s744_s27, %s950_s3 }
 0x2d7   :  { %p750_p3 = pnand %p748_p2, %p745_p1 }
 0x2d9   :  { %753 = shalt.err (!%p750_p3)
}
 0x2da   :  { %593 = dma.vmem_to_hbm [thread:$0]  %s591_s23, 32, %s950_s3, [#allocation4]  }
 0x2db   :  { %758 = dma.done.wait [#allocation4], 32  }
 0x2dc   :  { %759 = vsyncadd [#allocation4], 4294967264 }
 0x2dd   :  { %597 = vsyncpa [#allocation3], 1 }
 0x2de   :  { %598 = vsyncpa [#allocation6], 1 }
 0x2df   :  { %599 = vsyncpa [#allocation4], 1 }

</bundles_post_ra>
